<compile_context>
chip_gen: v5e
topology: v5e:2x2
jax: 0.10.0
libtpu: 0.0.40
codegen_flags: <defaults>
</compile_context>

<pallas_src>
import jax
import jax.numpy as jnp
from jax.experimental import pallas as pl
from jax.experimental.pallas import tpu as pltpu


_OUT_SUB, _OUT_LANE = 8, 128              # lane/sublane-dense per-block partial-sum tile
_VMEM_STRIPE_BUDGET = 24 * 1024 * 1024    # conservative working-set budget per stripe


def _round_up(v, m):
    return -(-v // m) * m


def _pick_row_tile(B, N, itemsize):
    """Rows per stripe. Multiple of 128 when tiled; sized for v7x's 64 MiB VMEM."""
    bp8 = _round_up(B, 8)
    if bp8 <= 128:
        return bp8                         # single row stripe; grid of 1
    # Multi-block: TR must be a multiple of 128 so the (TR, TR) diagonal block spec
    # stays (8,128)-aligned and lane-dense.  Shrink until the double-buffered input
    # stripe plus f32 working copies fit the conservative VMEM budget.
    tr = 512
    per_row = N * (2 * itemsize + 8)       # 2x input buffers + ~2 f32 temps per element
    while tr > 128 and tr * per_row > _VMEM_STRIPE_BUDGET:
        tr -= 128
    # TODO(synk): for very large n_classes (roughly N >= 32k) add a column grid axis with
    # flash-style online log-sum-exp instead of a full-width row stripe.
    return min(tr, _round_up(B, 128))


def _make_nce_kernel(B, TR, separate_diag):
    """Kernel over one (TR, Np) row stripe; writes that stripe's summed CE terms."""

    def _finish(x, sub, i, o_ref):
        # numerically stable log-sum-exp over the class (lane) axis
        m = jnp.max(x, axis=-1, keepdims=True)                        # (TR, 1)
        s = jnp.sum(jnp.exp(x - m), axis=-1, keepdims=True)           # (TR, 1)
        lse = m + jnp.log(s)                                          # (TR, 1)

        # positive logit of global row r is column r -> diagonal of the (TR, TR) sub-block
        rr = jax.lax.broadcasted_iota(jnp.int32, (TR, TR), 0)
        cc = jax.lax.broadcasted_iota(jnp.int32, (TR, TR), 1)
        diag = jnp.sum(jnp.where(rr == cc, sub, 0.0), axis=-1, keepdims=True)  # (TR, 1)

        # mask rows that are padding (global row index >= B)
        grow = i * TR + jax.lax.broadcasted_iota(jnp.int32, (TR, 1), 0)
        term = jnp.where(grow < B, lse - diag, 0.0)

        o_ref[...] = jnp.broadcast_to(
            jnp.sum(term), (1, _OUT_SUB, _OUT_LANE)).astype(jnp.float32)

    if separate_diag:
        def kernel(x_ref, d_ref, o_ref):
            i = pl.program_id(0)
            x = x_ref[...].astype(jnp.float32)        # (TR, Np) row stripe
            sub = d_ref[...].astype(jnp.float32)      # (TR, TR) diagonal sub-block
            _finish(x, sub, i, o_ref)
    else:
        def kernel(x_ref, o_ref):
            i = pl.program_id(0)
            x = x_ref[...].astype(jnp.float32)
            sub = x[:, :TR]                           # single block: static slice
            _finish(x, sub, i, o_ref)
    return kernel


def nce_softmax_loss_ns(x):
    """JAX/Pallas equivalent of NCESoftmaxLossNS.forward(x)."""
    bsz = x.shape[0]
    # torch .squeeze(): drop all singleton dims (glue; stays in plain JAX).
    x2d = jnp.squeeze(x)
    assert x2d.ndim == 2 and x2d.shape[0] == bsz, (
        "expected squeezed logits [bsz, n_classes]; bsz == 1 hits the same .squeeze() "
        "pitfall as the PyTorch module")
    B, N = x2d.shape
    assert N >= B, "labels arange(bsz) require n_classes >= bsz"

    itemsize = jnp.dtype(x2d.dtype).itemsize
    TR = _pick_row_tile(B, N, itemsize)
    num_blocks = -(-B // TR)
    Bp = num_blocks * TR
    Np = max(N, Bp)         # keep the diagonal sub-block of the last stripe in bounds

    if Bp != B or Np != N:
        # pad value = dtype min: exp() underflows to 0 so LSE of real rows is unchanged;
        # fully padded rows are masked out inside the kernel.
        pad_val = float(jnp.finfo(x2d.dtype).min)
        x2d = jnp.pad(x2d, ((0, Bp - B), (0, Np - N)), constant_values=pad_val)

    separate_diag = num_blocks > 1
    in_specs = [pl.BlockSpec((TR, Np), lambda i: (i, 0))]
    operands = [x2d]
    if separate_diag:
        in_specs.append(pl.BlockSpec((TR, TR), lambda i: (i, i)))
        operands.append(x2d)

    partial = pl.pallas_call(
        _make_nce_kernel(B, TR, separate_diag),
        out_shape=jax.ShapeDtypeStruct((num_blocks, _OUT_SUB, _OUT_LANE), jnp.float32),
        grid=(num_blocks,),
        in_specs=in_specs,
        out_specs=pl.BlockSpec((1, _OUT_SUB, _OUT_LANE), lambda i: (i, 0, 0)),
        compiler_params=pltpu.CompilerParams(
            dimension_semantics=("parallel",),
            vmem_limit_bytes=48 * 1024 * 1024,
        ),
    )(*operands)

    # tiny final reduction (num_blocks scalars) in plain JAX
    return jnp.sum(partial[:, 0, 0]) / jnp.float32(B)


def _reference_loss(x):
    x2d = jnp.squeeze(x).astype(jnp.float32)
    b = x2d.shape[0]
    logp = jax.nn.log_softmax(x2d, axis=-1)
    return -jnp.mean(logp[jnp.arange(b), jnp.arange(b)])


if __name__ == "__main__":
    # 1) CPC/CMC usage: [bsz, 1, bsz] similarity logits, positive on the diagonal.
    key = jax.random.PRNGKey(0)
    bsz = 8
    x = jax.random.normal(key, (bsz, 1, bsz), dtype=jnp.float32)
    loss = nce_softmax_loss_ns(x)
    jax.block_until_ready(loss)
    ref = _reference_loss(x)
    assert jnp.allclose(loss, ref, rtol=1e-5, atol=1e-5), (loss, ref)

    # 2) non-square bf16 logits (8 anchors vs 12 candidates), bf16 kept through the DMA.
    x2 = jax.random.normal(jax.random.PRNGKey(1), (8, 1, 12), dtype=jnp.bfloat16)
    l2 = nce_softmax_loss_ns(x2)
    jax.block_until_ready(l2)
    assert jnp.allclose(l2, _reference_loss(x2), rtol=1e-5, atol=1e-5), (l2, _reference_loss(x2))

    # 3) larger square logits: exercises the multi-row-block path (separate diagonal
    #    BlockSpec, row/column padding, padded-row masking, "parallel" grid axis).
    x3 = jax.random.normal(jax.random.PRNGKey(2), (560, 560), dtype=jnp.float32)
    l3 = nce_softmax_loss_ns(x3)
    jax.block_until_ready(l3)
    assert jnp.allclose(l3, _reference_loss(x3), rtol=1e-4, atol=1e-4), (l3, _reference_loss(x3))

    print("KERNEL_OK")
</pallas_src>

<mosaic_0001>
module attributes {stable_mosaic.version = 11 : i64} {
  func.func @kernel(%arg0: i32, %arg1: memref<8x8xf32, #tpu.memory_space<vmem>>, %arg2: memref<1x8x128xf32, #tpu.memory_space<vmem>>) attributes {dimension_semantics = [#tpu.dimension_semantics<parallel>], iteration_bounds = array<i64: 1>, scalar_prefetch = 0 : i64, scratch_operands = 0 : i64, tpu.core_type = #tpu.core_type<tc>, window_params = [{transform_indices = @transform_0, window_bounds = array<i64: 8, 8>}, {transform_indices = @transform_1, window_bounds = array<i64: 1, 8, 128>}]} {
    %c0 = arith.constant 0 : index
    %c0_0 = arith.constant 0 : index
    %0 = vector.load %arg1[%c0, %c0_0] : memref<8x8xf32, #tpu.memory_space<vmem>>, vector<8x8xf32>
    %cst = arith.constant dense<0xFF800000> : vector<8xf32>
    %1 = vector.multi_reduction <maximumf>, %0, %cst [1] : vector<8x8xf32> to vector<8xf32>
    %2 = vector.shape_cast %1 : vector<8xf32> to vector<8x1xf32>
    %3 = vector.broadcast %2 : vector<8x1xf32> to vector<8x8xf32>
    %4 = arith.subf %0, %3 : vector<8x8xf32>
    %5 = math.exp %4 : vector<8x8xf32>
    %cst_1 = arith.constant dense<0.000000e+00> : vector<8xf32>
    %6 = vector.multi_reduction <add>, %5, %cst_1 [1] : vector<8x8xf32> to vector<8xf32>
    %7 = vector.shape_cast %6 : vector<8xf32> to vector<8x1xf32>
    %8 = math.log %7 : vector<8x1xf32>
    %9 = arith.addf %2, %8 : vector<8x1xf32>
    %10 = tpu.iota {dimensions = array<i32: 0>} : vector<8x8xi32>
    %11 = tpu.iota {dimensions = array<i32: 1>} : vector<8x8xi32>
    %12 = arith.cmpi eq, %10, %11 : vector<8x8xi32>
    %cst_2 = arith.constant 0.000000e+00 : f32
    %13 = vector.broadcast %cst_2 : f32 to vector<8x8xf32>
    %14 = arith.select %12, %0, %13 : vector<8x8xi1>, vector<8x8xf32>
    %cst_3 = arith.constant dense<0.000000e+00> : vector<8xf32>
    %15 = vector.multi_reduction <add>, %14, %cst_3 [1] : vector<8x8xf32> to vector<8xf32>
    %16 = vector.shape_cast %15 : vector<8xf32> to vector<8x1xf32>
    %c8_i32 = arith.constant 8 : i32
    %17 = arith.muli %arg0, %c8_i32 : i32
    %18 = tpu.iota {dimensions = array<i32: 0>} : vector<8x1xi32>
    %19 = vector.broadcast %17 : i32 to vector<8x1xi32>
    %20 = arith.addi %19, %18 : vector<8x1xi32>
    %c8_i32_4 = arith.constant 8 : i32
    %21 = vector.broadcast %c8_i32_4 : i32 to vector<8x1xi32>
    %22 = arith.cmpi slt, %20, %21 : vector<8x1xi32>
    %23 = arith.subf %9, %16 : vector<8x1xf32>
    %cst_5 = arith.constant 0.000000e+00 : f32
    %24 = vector.broadcast %cst_5 : f32 to vector<8x1xf32>
    %25 = arith.select %22, %23, %24 : vector<8x1xi1>, vector<8x1xf32>
    %26 = vector.shape_cast %25 : vector<8x1xf32> to vector<1x8x1xf32>
    %cst_6 = arith.constant dense<0.000000e+00> : vector<1xf32>
    %27 = vector.multi_reduction <add>, %26, %cst_6 [1, 2] : vector<1x8x1xf32> to vector<1xf32>
    %28 = vector.shape_cast %27 : vector<1xf32> to vector<1x1x1xf32>
    %29 = vector.extract %28[0, 0, 0] : f32 from vector<1x1x1xf32>
    %30 = vector.broadcast %29 : f32 to vector<1x8x128xf32>
    %c0_7 = arith.constant 0 : index
    %c0_8 = arith.constant 0 : index
    %c0_9 = arith.constant 0 : index
    %31 = vector.load %arg2[%c0_7, %c0_8, %c0_9] : memref<1x8x128xf32, #tpu.memory_space<vmem>>, vector<1x8x128xf32>
    tpu.vector_store %arg2[%c0_7, %c0_8, %c0_9], %30 {strides = array<i32>} : memref<1x8x128xf32, #tpu.memory_space<vmem>>, vector<1x8x128xf32>,
    return
  }
  func.func @transform_0(%arg0: i32) -> (i32, i32) {
    %c0_i32 = arith.constant 0 : i32
    %c0_i32_0 = arith.constant 0 : i32
    return %arg0, %c0_i32 : i32, i32
  }
  func.func @transform_1(%arg0: i32) -> (i32, i32, i32) {
    %c0_i32 = arith.constant 0 : i32
    %c0_i32_0 = arith.constant 0 : i32
    %c0_i32_1 = arith.constant 0 : i32
    return %arg0, %c0_i32, %c0_i32_0 : i32, i32, i32
  }
}

</mosaic_0001>

<bundles_post_ra>
// kernel: tpu_custom_call.1
= control target key start
LH: loop header
LB: loop body
LE: loop exit
PB: predicated region body
PF: predicated region fallthrough
CT: control target
= control target key end

     0   :  { %6 = vsyncpa [#allocation3], 0  ;;  %s163_s0 = inlined_call_operand.hbm [shape: f32[8,8], index: 0, kind: input, shape index: {}]   ;;  %s164_s1 = inlined_call_operand.hbm [shape: f32[1,8,128], index: 1, kind: output, shape index: {}]  }
   0x1   :  { %7 = vsyncpa [#allocation4], 0  ;;  %s13_s8 = sshll.u32 %s163_s0, 4  ;;  %s142_s9 = smov [#allocation2]   ;;  %s14_s8 = int_to_ptr.hbm [resolvable:$true] %s13_s8 }
   0x2   :  { %s15_s10 = sshll.u32 %s142_s9, 4  ;;  %s16_s10 = int_to_ptr.vmem [resolvable:$true] %s15_s10 }
   0x3   :  { %18 = dma.hbm_to_vmem [thread:$0]  %s14_s8, 128, %s16_s10, [#allocation3]  }
   0x4   :  { %138 = dma.done.wait [#allocation3], 128  }
   0x5   :  { %139 = vsyncadd [#allocation3], 4294967168  ;;  %vm24_vm0 = vcmask 64512   ;;  %v23_v0 = vld [vmem:[#allocation2] sm:$0xff]  ;;  %v37_v2 = vlaneseq  ;;  %vm52_vm2 = vcmask 7168   ;;  %s143_s0 = smov [#allocation5]  }
   0x6   :  { %v25_v1 = vsel %vm24_vm0, %v23_v0, -inf  ;;  %s70_s11 = sshll.u32 %s143_s0, 4  ;;  %s72_s14 = sshll.u32 %s164_s1, 4  ;;  %s71_s11 = int_to_ptr.vmem [resolvable:$true] %s70_s11  ;;  %s73_s14 = int_to_ptr.hbm [resolvable:$true] %s72_s14 }
   0x7   :  { %26 = vmax.xlane.f32.xlu0 %v25_v1  ;;  %v38_v3 = vshrl.u32 %v37_v2, 7  ;;  %v40_v4 = vand.u32 127, %v37_v2 }
   0x9   :  { %vm41_vm1 = vcmp.eq.s32.totalorder %v38_v3, %v40_v4 }
   0xa   :  { %v42_v5 = vsel %vm41_vm1, %v23_v0, 0.0 }
   0xb   :  { %v43_v6 = vsel %vm24_vm0, %v42_v5, 0.0 }
   0xc   :  { %44 = vadd.xlane.f32.xlu1 %v43_v6 }
  0x7a   :  { %v27_v7 = vpop.xlane.xlu0 %26 }
  0x7b   :  { %v28_v8 = vsub.f32 %v23_v0, %v27_v7 }
  0x7d   :  { %v29_v9 = vmul.f32 1.442695, %v28_v8 }
  0x7f   :  { %86 = vpow2.f32 %v29_v9  ;;  %v45_v15 = vpop.xlane.xlu1 %44 }
  0x85   :  { %v87_v10 = vpop.eup %86 }
  0x86   :  { %v31_v11 = vsel %vm24_vm0, %v87_v10, 0.0 }
  0x87   :  { %32 = vadd.xlane.f32.xlu0 %v31_v11 }
  0xfa   :  { %v33_v12 = vpop.xlane.xlu0 %32 }
  0xfb   :  { %88 = vlog2.f32 %v33_v12 }
 0x101   :  { %v89_v13 = vpop.eup %88 }
 0x102   :  { %v35_v14 = vmul.f32 0.6931472, %v89_v13 }
 0x104   :  { %v36_v16 = vadd.f32 %v35_v14, %v27_v7 }
 0x106   :  { %v50_v17 = vsub.f32 %v36_v16, %v45_v15 }
 0x108   :  { %v53_v18 = vsel %vm52_vm2, %v50_v17, 0.0 }
 0x109   :  { %54 = vadd.xlane.f32.xlu1 %v53_v18 }
 0x17c   :  { %v55_v19 = vpop.xlane.xlu1 %54 }
 0x17d   :  { %v56_v20 = vrot.slane %v55_v19, 4 }
 0x17f   :  { %v57_v21 = vadd.f32 %v56_v20, %v55_v19 }
 0x181   :  { %v58_v22 = vrot.slane %v57_v21, 2 }
 0x183   :  { %v59_v23 = vadd.f32 %v58_v22, %v57_v21 }
 0x185   :  { %v60_v24 = vrot.slane %v59_v23, 1 }
 0x187   :  { %v61_v25 = vadd.f32 %v60_v24, %v59_v23 }
 0x189   :  { %82 = vpush %v61_v25 }
 0x1ba   :  { %s83_s15 = spop %82 }
 0x1bb   :  { %v63_v26 = vstv %s83_s15 }
 0x1bc   :  { %64 = vst [vmem:[#allocation5] sm:$0xff] %v63_v26 }
 0x1bd   :  { %75 = dma.vmem_to_hbm [thread:$0]  %s71_s11, 128, %s73_s14, [#allocation4]  }
 0x1be   :  { %140 = dma.done.wait [#allocation4], 128  }
 0x1bf   :  { %141 = vsyncadd [#allocation4], 4294967168 }
 0x1c0   :  { %80 = vsyncpa [#allocation3], 1 }
 0x1c1   :  { %81 = vsyncpa [#allocation4], 1 }

</bundles_post_ra>
